<compile_context>
chip_gen: v5e
topology: v5e:2x2
jax: 0.10.0
libtpu: 0.0.40
codegen_flags: <defaults>
</compile_context>

<pallas_src>
import functools

import jax
import jax.numpy as jnp
from jax.experimental import pallas as pl
from jax.experimental.pallas import tpu as pltpu

INPUT_SIZE = 1
HIDDEN_SIZE = 64
OUTPUT_SIZE = 1


def _round_up(n, m):
    return ((n + m - 1) // m) * m


def _cdiv(a, b):
    return -(-a // b)


def mlp_kernel(x_ref, w1_ref, b1_ref, w2_ref, b2_ref, o_ref, *, compute_dtype):
    # Transposed, lane-dense layout (batch on the lane axis):
    #   x_ref : (1, TILE_B)        one input feature per sample
    #   w1_ref: (HIDDEN, 1)        == PyTorch layer1.weight  (shape [out=64, in=1])
    #   b1_ref: (HIDDEN, 1)
    #   w2_ref: (HIDDEN, 1)        == PyTorch layer2.weight.T
    #   b2_ref: (1, 1)
    #   o_ref : (1, TILE_B)
    x = x_ref[...].astype(compute_dtype)                   # (1, TILE_B)
    w1 = w1_ref[...].astype(compute_dtype)                  # (HIDDEN, 1)
    b1 = b1_ref[...].astype(compute_dtype)
    w2 = w2_ref[...].astype(compute_dtype)

    h = jnp.maximum(w1 * x + b1, 0)                         # (HIDDEN, TILE_B), VPU
    hw = (h * w2).astype(jnp.float32)                       # f32 accumulation for reduce
    # Sublane reduce over the 64 hidden rows -> (1, TILE_B); lands on XLU/cross-vreg adds,
    # off the saturated VALU slot.
    y = jnp.sum(hw, axis=0, keepdims=True) + b2_ref[...]
    o_ref[...] = y.astype(o_ref.dtype)


@functools.partial(jax.jit, static_argnames=("tile_cap", "use_bf16_hidden"))
def generative_model_forward(x, w1, b1, w2, b2, *, tile_cap=16384, use_bf16_hidden=False):
    """x: (B, INPUT_SIZE) f32 -> (B, OUTPUT_SIZE) f32.

    Weight layout: w1 (HIDDEN, INPUT) == PyTorch layer1.weight, b1 (HIDDEN, 1),
    w2 (HIDDEN, OUTPUT) == PyTorch layer2.weight.T, b2 (1, OUTPUT).
    """
    B = x.shape[0]
    compute_dtype = jnp.bfloat16 if use_bf16_hidden else jnp.float32

    # Lane-dense layout: batch on the last (lane) axis. (B,1) -> (1,B) is a
    # contiguity-preserving reshape, not a data-movement transpose.
    x_t = x.reshape(B, INPUT_SIZE).T                        # (1, B)

    # Pad only to a multiple of 128 lanes (<= 127 extra elements); the ragged last
    # grid block (if any) is masked by Pallas and padded lanes are sliced off below.
    b_pad = _round_up(max(B, 1), 128)
    if b_pad != B:
        x_t = jnp.pad(x_t, ((0, 0), (0, b_pad - B)))

    # Tile selection: multiple of 128, capped for VMEM (256*tb bytes per (64, tb) f32
    # temporary), and >=2 grid steps when possible so both v7x TensorCores get work.
    tb = min(_round_up(tile_cap, 128), b_pad)
    n_steps = _cdiv(b_pad, tb)
    if n_steps < 2 and b_pad >= 256:
        tb = _round_up(_cdiv(b_pad, 2), 128)
        n_steps = _cdiv(b_pad, tb)
    grid = (n_steps,)

    kernel = functools.partial(mlp_kernel, compute_dtype=compute_dtype)

    out_t = pl.pallas_call(
        kernel,
        out_shape=jax.ShapeDtypeStruct((OUTPUT_SIZE, b_pad), jnp.float32),
        grid=grid,
        in_specs=[
            pl.BlockSpec((1, tb), lambda i: (0, i)),            # x: lane-dense batch tiles
            pl.BlockSpec((HIDDEN_SIZE, 1), lambda i: (0, 0)),   # w1 (resident)
            pl.BlockSpec((HIDDEN_SIZE, 1), lambda i: (0, 0)),   # b1 (resident)
            pl.BlockSpec((HIDDEN_SIZE, 1), lambda i: (0, 0)),   # w2 (resident)
            pl.BlockSpec((1, 1), lambda i: (0, 0)),             # b2 (resident)
        ],
        out_specs=pl.BlockSpec((1, tb), lambda i: (0, i)),
        compiler_params=pltpu.CompilerParams(
            dimension_semantics=(pltpu.PARALLEL,),   # batch tiles shard across TCs on v7x
            vmem_limit_bytes=48 * 1024 * 1024,       # above default scoped limit, headroom on v7x
        ),
        cost_estimate=pl.CostEstimate(
            # ~mul+add (layer1) + relu-select + mul + reduce-add per hidden unit per sample
            flops=5 * b_pad * HIDDEN_SIZE,
            transcendentals=0,
            bytes_accessed=b_pad * 4 * 2 + HIDDEN_SIZE * 3 * 4 + 4,
        ),
    )(x_t, w1, b1, w2, b2)

    return out_t[:, :B].T                                   # (B, OUTPUT_SIZE)


def init_params(key):
    # Deterministic init mimicking nn.Linear's uniform(-1/sqrt(fan_in), 1/sqrt(fan_in)),
    # stored directly in the column layout the kernel wants.
    k1, k2, k3, k4 = jax.random.split(key, 4)
    bound1 = 1.0 / float(INPUT_SIZE) ** 0.5
    bound2 = 1.0 / float(HIDDEN_SIZE) ** 0.5
    w1 = jax.random.uniform(k1, (HIDDEN_SIZE, INPUT_SIZE), jnp.float32, -bound1, bound1)   # == W1
    b1 = jax.random.uniform(k2, (HIDDEN_SIZE, 1), jnp.float32, -bound1, bound1)
    w2 = jax.random.uniform(k3, (HIDDEN_SIZE, OUTPUT_SIZE), jnp.float32, -bound2, bound2)  # == W2.T
    b2 = jax.random.uniform(k4, (1, OUTPUT_SIZE), jnp.float32, -bound2, bound2)
    return w1, b1, w2, b2


if __name__ == "__main__":
    key = jax.random.PRNGKey(0)
    pkey, xkey = jax.random.split(key)
    w1, b1, w2, b2 = init_params(pkey)

    batch = 8
    x = jax.random.normal(xkey, (batch, INPUT_SIZE), jnp.float32)

    out = generative_model_forward(x, w1, b1, w2, b2)
    out = jax.block_until_ready(out)

    # Reference (same math as the PyTorch forward): relu(x @ W1.T + b1) @ W2.T + b2
    ref = jnp.maximum(x @ w1.T + b1.T, 0.0) @ w2 + b2
    assert out.shape == (batch, OUTPUT_SIZE)
    assert jnp.allclose(out, ref, atol=1e-5, rtol=1e-5)

    print("KERNEL_OK")
</pallas_src>

<mosaic_0001>
module attributes {stable_mosaic.version = 11 : i64} {
  func.func @mlp_kernel(%arg0: i32, %arg1: memref<1x128xf32, #tpu.memory_space<vmem>>, %arg2: memref<64x1xf32, #tpu.memory_space<vmem>>, %arg3: memref<64x1xf32, #tpu.memory_space<vmem>>, %arg4: memref<64x1xf32, #tpu.memory_space<vmem>>, %arg5: memref<1x1xf32, #tpu.memory_space<vmem>>, %arg6: memref<1x128xf32, #tpu.memory_space<vmem>>) attributes {dimension_semantics = [#tpu.dimension_semantics<parallel>], iteration_bounds = array<i64: 1>, scalar_prefetch = 0 : i64, scratch_operands = 0 : i64, tpu.core_type = #tpu.core_type<tc>, window_params = [{transform_indices = @transform_0, window_bounds = array<i64: 1, 128>}, {pipeline_mode = #tpu.pipeline_mode<synchronous>, transform_indices = @transform_1, window_bounds = array<i64: 64, 1>}, {pipeline_mode = #tpu.pipeline_mode<synchronous>, transform_indices = @transform_2, window_bounds = array<i64: 64, 1>}, {pipeline_mode = #tpu.pipeline_mode<synchronous>, transform_indices = @transform_3, window_bounds = array<i64: 64, 1>}, {pipeline_mode = #tpu.pipeline_mode<synchronous>, transform_indices = @transform_4, window_bounds = array<i64: 1, 1>}, {transform_indices = @transform_5, window_bounds = array<i64: 1, 128>}]} {
    %c0 = arith.constant 0 : index
    %c0_0 = arith.constant 0 : index
    %0 = vector.load %arg1[%c0, %c0_0] : memref<1x128xf32, #tpu.memory_space<vmem>>, vector<1x128xf32>
    %c0_1 = arith.constant 0 : index
    %c0_2 = arith.constant 0 : index
    %1 = vector.load %arg2[%c0_1, %c0_2] : memref<64x1xf32, #tpu.memory_space<vmem>>, vector<64x1xf32>
    %c0_3 = arith.constant 0 : index
    %c0_4 = arith.constant 0 : index
    %2 = vector.load %arg3[%c0_3, %c0_4] : memref<64x1xf32, #tpu.memory_space<vmem>>, vector<64x1xf32>
    %c0_5 = arith.constant 0 : index
    %c0_6 = arith.constant 0 : index
    %3 = vector.load %arg4[%c0_5, %c0_6] : memref<64x1xf32, #tpu.memory_space<vmem>>, vector<64x1xf32>
    %4 = vector.broadcast %1 : vector<64x1xf32> to vector<64x128xf32>
    %5 = vector.broadcast %0 : vector<1x128xf32> to vector<64x128xf32>
    %6 = arith.mulf %4, %5 : vector<64x128xf32>
    %7 = vector.broadcast %2 : vector<64x1xf32> to vector<64x128xf32>
    %8 = arith.addf %6, %7 : vector<64x128xf32>
    %cst = arith.constant 0.000000e+00 : f32
    %9 = vector.broadcast %cst : f32 to vector<64x128xf32>
    %10 = arith.maximumf %8, %9 : vector<64x128xf32>
    %11 = vector.broadcast %3 : vector<64x1xf32> to vector<64x128xf32>
    %12 = arith.mulf %10, %11 : vector<64x128xf32>
    %cst_7 = arith.constant dense<0.000000e+00> : vector<128xf32>
    %13 = vector.multi_reduction <add>, %12, %cst_7 [0] : vector<64x128xf32> to vector<128xf32>
    %14 = vector.shape_cast %13 : vector<128xf32> to vector<1x128xf32>
    %c0_8 = arith.constant 0 : index
    %c0_9 = arith.constant 0 : index
    %15 = vector.load %arg5[%c0_8, %c0_9] : memref<1x1xf32, #tpu.memory_space<vmem>>, vector<1x1xf32>
    %16 = vector.broadcast %15 : vector<1x1xf32> to vector<1x128xf32>
    %17 = arith.addf %14, %16 : vector<1x128xf32>
    %c0_10 = arith.constant 0 : index
    %c0_11 = arith.constant 0 : index
    %18 = vector.load %arg6[%c0_10, %c0_11] : memref<1x128xf32, #tpu.memory_space<vmem>>, vector<1x128xf32>
    tpu.vector_store %arg6[%c0_10, %c0_11], %17 {strides = array<i32>} : memref<1x128xf32, #tpu.memory_space<vmem>>, vector<1x128xf32>,
    return
  }
  func.func @transform_0(%arg0: i32) -> (i32, i32) {
    %c0_i32 = arith.constant 0 : i32
    %c0_i32_0 = arith.constant 0 : i32
    return %c0_i32, %arg0 : i32, i32
  }
  func.func @transform_1(%arg0: i32) -> (i32, i32) {
    %c0_i32 = arith.constant 0 : i32
    %c0_i32_0 = arith.constant 0 : i32
    %c0_i32_1 = arith.constant 0 : i32
    return %c0_i32, %c0_i32_0 : i32, i32
  }
  func.func @transform_2(%arg0: i32) -> (i32, i32) {
    %c0_i32 = arith.constant 0 : i32
    %c0_i32_0 = arith.constant 0 : i32
    %c0_i32_1 = arith.constant 0 : i32
    return %c0_i32, %c0_i32_0 : i32, i32
  }
  func.func @transform_3(%arg0: i32) -> (i32, i32) {
    %c0_i32 = arith.constant 0 : i32
    %c0_i32_0 = arith.constant 0 : i32
    %c0_i32_1 = arith.constant 0 : i32
    return %c0_i32, %c0_i32_0 : i32, i32
  }
  func.func @transform_4(%arg0: i32) -> (i32, i32) {
    %c0_i32 = arith.constant 0 : i32
    %c0_i32_0 = arith.constant 0 : i32
    %c0_i32_1 = arith.constant 0 : i32
    return %c0_i32, %c0_i32_0 : i32, i32
  }
  func.func @transform_5(%arg0: i32) -> (i32, i32) {
    %c0_i32 = arith.constant 0 : i32
    %c0_i32_0 = arith.constant 0 : i32
    return %c0_i32, %arg0 : i32, i32
  }
}

</mosaic_0001>

<bundles_post_ra>
// kernel: generative_model_forward.1
= control target key start
LH: loop header
LB: loop body
LE: loop exit
PB: predicated region body
PF: predicated region fallthrough
CT: control target
= control target key end

     0   :  { %v233_v0 = vmov 0   ;;  %s345_s1 = inlined_call_operand.vmem [shape: f32[64,1], index: 1, kind: input, shape index: {}]   ;;  %s346_s0 = inlined_call_operand.vmem [shape: f32[1,128], index: 0, kind: input, shape index: {}]   ;;  %s347_s2 = inlined_call_operand.vmem [shape: f32[64,1], index: 2, kind: input, shape index: {}]   ;;  %s348_s4 = inlined_call_operand.<no memory space> [shape: f32[1,1], index: 4, kind: input, shape index: {}]   ;;  %s349_s3 = inlined_call_operand.vmem [shape: f32[64,1], index: 3, kind: input, shape index: {}]   ;;  %s350_s5 = inlined_call_operand.vmem [shape: f32[1,128], index: 5, kind: output, shape index: {}]  }
   0x1   :  { %231 = vset.pattern.permute.xlu2 %v233_v0  ;;  %230 = vset.pattern.permute.xlu1 %v233_v0  ;;  %v27_v1 = vld [vmem:[%s345_s1 + $0x20] sm:$0xff]  ;;  %v25_v2 = vld [vmem:[%s345_s1 + $0x10] sm:$0xff]  ;;  %v28_v4 = vld [vmem:[%s345_s1 + $0x28] sm:$0xff]  ;;  %v10_v13 = vstv %s348_s4 }
   0x2   :  { %v23_v3 = vld [vmem:[%s345_s1] sm:$0xff]  ;;  %229 = vset.pattern.permute.xlu0 %v233_v0  ;;  %69 = vperm.xlu2 %231, %v27_v1   ;;  %v26_v5 = vld [vmem:[%s345_s1 + $0x18] sm:$0xff]  ;;  %v24_v6 = vld [vmem:[%s345_s1 + $0x8] sm:$0xff]  ;;  %11 = vst [vmem:[#allocation2] sm:$0x1] %v10_v13 }
   0x3   :  { %59 = vperm.xlu1 %230, %v25_v2   ;;  %49 = vperm.xlu0 %229, %v23_v3   ;;  %v31_v7 = vld [vmem:[%s347_s2] sm:$0xff]  ;;  %v30_v8 = vld [vmem:[%s345_s1 + $0x38] sm:$0xff]  ;;  %v29_v9 = vld [vmem:[%s345_s1 + $0x30] sm:$0xff] }
   0x4   :  { %v34_v10 = vld [vmem:[%s347_s2 + $0x18] sm:$0xff]  ;;  %v33_v11 = vld [vmem:[%s347_s2 + $0x10] sm:$0xff]  ;;  %v32_v12 = vld [vmem:[%s347_s2 + $0x8] sm:$0xff] }
   0x5   :  { %v39_v14 = vld [vmem:[%s349_s3] sm:$0xff]  ;;  %v36_v15 = vld [vmem:[%s347_s2 + $0x28] sm:$0xff]  ;;  %v42_v17 = vld [vmem:[%s349_s3 + $0x18] sm:$0xff] }
   0x6   :  { %v35_v16 = vld [vmem:[%s347_s2 + $0x20] sm:$0xff]  ;;  %v41_v18 = vld [vmem:[%s349_s3 + $0x10] sm:$0xff]  ;;  %v40_v19 = vld [vmem:[%s349_s3 + $0x8] sm:$0xff] }
   0x7   :  { %v38_v20 = vld [vmem:[%s347_s2 + $0x38] sm:$0xff]  ;;  %v43_v21 = vld [vmem:[%s349_s3 + $0x20] sm:$0xff]  ;;  %v37_v22 = vld [vmem:[%s347_s2 + $0x30] sm:$0xff] }
   0x8   :  { %v46_v23 = vld [vmem:[%s349_s3 + $0x38] sm:$0xff]  ;;  %v45_v24 = vld [vmem:[%s349_s3 + $0x30] sm:$0xff]  ;;  %v44_v25 = vld [vmem:[%s349_s3 + $0x28] sm:$0xff] }
   0x9   :  { %v215_v26 = vld [vmem:[#allocation2] sm:$0x1] }
   0xa   :  { %74 = vperm.xlu2 %231, %v28_v4   ;;  %v232_v40 = vld [vmem:[%s346_s0] ss:$0 sm:$0xff] }
   0xb   :  { %64 = vperm.xlu1 %230, %v26_v5   ;;  %54 = vperm.xlu0 %229, %v24_v6  }
  0x12   :  { %100 = vperm.xlu2 %231, %v31_v7  }
  0x13   :  { %84 = vperm.xlu1 %230, %v30_v8   ;;  %79 = vperm.xlu0 %229, %v29_v9  }
  0x1a   :  { %115 = vperm.xlu2 %231, %v34_v10  }
  0x1b   :  { %110 = vperm.xlu1 %230, %v33_v11   ;;  %105 = vperm.xlu0 %229, %v32_v12  }
  0x22   :  { %156 = vperm.xlu2 %231, %v39_v14  }
  0x23   :  { %125 = vperm.xlu1 %230, %v36_v15   ;;  %120 = vperm.xlu0 %229, %v35_v16  }
  0x2a   :  { %171 = vperm.xlu2 %231, %v42_v17  }
  0x2b   :  { %166 = vperm.xlu1 %230, %v41_v18   ;;  %161 = vperm.xlu0 %229, %v40_v19  }
  0x32   :  { %135 = vperm.xlu2 %231, %v38_v20  }
  0x33   :  { %176 = vperm.xlu1 %230, %v43_v21   ;;  %130 = vperm.xlu0 %229, %v37_v22  }
  0x3a   :  { %191 = vperm.xlu2 %231, %v46_v23  }
  0x3b   :  { %186 = vperm.xlu1 %230, %v45_v24   ;;  %181 = vperm.xlu0 %229, %v44_v25  }
  0x43   :  { %218 = vperm.xlu0 %229, %v215_v26  }
  0x5c   :  { %v70_v27 = vpop.permute.xlu2 %69 }
  0x5d   :  { %v94_v56 = vmul.f32 %v232_v40, %v70_v27 }
  0x64   :  { %v75_v28 = vpop.permute.xlu2 %74 }
  0x65   :  { %v95_v1 = vmul.f32 %v232_v40, %v75_v28 }
  0x6c   :  { %v101_v31 = vpop.permute.xlu2 %100 }
  0x74   :  { %v116_v36 = vpop.permute.xlu2 %115 }
  0x75   :  { %v60_v29 = vpop.permute.xlu1 %59  ;;  %v50_v30 = vpop.permute.xlu0 %49 }
  0x76   :  { %v90_v43 = vmul.f32 %v232_v40, %v50_v30  ;;  %v92_v50 = vmul.f32 %v232_v40, %v60_v29 }
  0x78   :  { %v138_v47 = vadd.f32 %v101_v31, %v90_v43 }
  0x7a   :  { %v146_v53 = vmax.f32 %v138_v47, 0.0 }
  0x7c   :  { %v157_v39 = vpop.permute.xlu2 %156 }
  0x7d   :  { %v65_v32 = vpop.permute.xlu1 %64  ;;  %v55_v33 = vpop.permute.xlu0 %54  ;;  %v194_v57 = vmul.f32 %v157_v39, %v146_v53 }
  0x7e   :  { %v91_v44 = vmul.f32 %v232_v40, %v55_v33  ;;  %v93_v52 = vmul.f32 %v232_v40, %v65_v32 }
  0x80   :  { %v141_v58 = vadd.f32 %v116_v36, %v93_v52 }
  0x82   :  { %v149_v3 = vmax.f32 %v141_v58, 0.0 }
  0x84   :  { %v172_v45 = vpop.permute.xlu2 %171 }
  0x85   :  { %v85_v34 = vpop.permute.xlu1 %84  ;;  %v80_v35 = vpop.permute.xlu0 %79  ;;  %v197_v8 = vmul.f32 %v172_v45, %v149_v3 }
  0x86   :  { %v96_v4 = vmul.f32 %v232_v40, %v80_v35  ;;  %v97_v9 = vmul.f32 %v232_v40, %v85_v34 }
  0x8c   :  { %v136_v59 = vpop.permute.xlu2 %135 }
  0x8d   :  { %v111_v37 = vpop.permute.xlu1 %110  ;;  %v106_v38 = vpop.permute.xlu0 %105  ;;  %v145_v12 = vadd.f32 %v136_v59, %v97_v9 }
  0x8e   :  { %v139_v46 = vadd.f32 %v106_v38, %v91_v44  ;;  %v140_v54 = vadd.f32 %v111_v37, %v92_v50 }
  0x8f   :  { %v153_v21 = vmax.f32 %v145_v12, 0.0 }
  0x90   :  { %v147_v51 = vmax.f32 %v139_v46, 0.0  ;;  %v148_v60 = vmax.f32 %v140_v54, 0.0 }
  0x94   :  { %v192_v20 = vpop.permute.xlu2 %191 }
  0x95   :  { %v126_v41 = vpop.permute.xlu1 %125  ;;  %v121_v42 = vpop.permute.xlu0 %120  ;;  %v201_v24 = vmul.f32 %v192_v20, %v153_v21 }
  0x96   :  { %v142_v61 = vadd.f32 %v121_v42, %v94_v56  ;;  %v143_v5 = vadd.f32 %v126_v41, %v95_v1 }
  0x98   :  { %v150_v6 = vmax.f32 %v142_v61, 0.0  ;;  %v151_v13 = vmax.f32 %v143_v5, 0.0 }
  0x9d   :  { %v167_v48 = vpop.permute.xlu1 %166  ;;  %v162_v49 = vpop.permute.xlu0 %161 }
  0x9e   :  { %v195_v55 = vmul.f32 %v162_v49, %v147_v51  ;;  %v196_v2 = vmul.f32 %v167_v48, %v148_v60 }
  0xa0   :  { %v202_v62 = vadd.f32 %v195_v55, %v194_v57 }
  0xa2   :  { %v203_v7 = vadd.f32 %v202_v62, %v196_v2 }
  0xa4   :  { %v204_v14 = vadd.f32 %v203_v7, %v197_v8 }
  0xa5   :  { %v177_v63 = vpop.permute.xlu1 %176  ;;  %v131_v0 = vpop.permute.xlu0 %130 }
  0xa6   :  { %v198_v10 = vmul.f32 %v177_v63, %v150_v6  ;;  %v144_v11 = vadd.f32 %v131_v0, %v96_v4 }
  0xa8   :  { %v205_v17 = vadd.f32 %v204_v14, %v198_v10  ;;  %v152_v18 = vmax.f32 %v144_v11, 0.0 }
  0xad   :  { %v187_v15 = vpop.permute.xlu1 %186  ;;  %v182_v16 = vpop.permute.xlu0 %181 }
  0xae   :  { %v199_v19 = vmul.f32 %v182_v16, %v151_v13  ;;  %v200_v22 = vmul.f32 %v187_v15, %v152_v18 }
  0xb0   :  { %v206_v23 = vadd.f32 %v205_v17, %v199_v19 }
  0xb2   :  { %v207_v25 = vadd.f32 %v206_v23, %v200_v22 }
  0xb4   :  { %v208_v26 = vadd.f32 %v207_v25, %v201_v24 }
  0xb5   :  { %v219_v31 = vpop.permute.xlu0 %218 }
  0xb6   :  { %v209_v27 = vrot.slane %v208_v26, 4  ;;  %v221_v34 = vperm.slane %v219_v31, 0 }
  0xb8   :  { %v210_v28 = vadd.f32 %v209_v27, %v208_v26 }
  0xba   :  { %v211_v29 = vrot.slane %v210_v28, 2 }
  0xbc   :  { %v212_v30 = vadd.f32 %v211_v29, %v210_v28 }
  0xbe   :  { %v213_v32 = vrot.slane %v212_v30, 1 }
  0xc0   :  { %v214_v33 = vadd.f32 %v213_v32, %v212_v30 }
  0xc2   :  { %v222_v35 = vadd.f32 %v221_v34, %v214_v33 }
  0xc4   :  { %223 = vst [vmem:[%s350_s5] sm:$0x1] %v222_v35 }

</bundles_post_ra>
